<compile_context>
chip_gen: v7x
topology: tpu7x:2x2x1
jax: 0.10.0
libtpu: 0.0.40
codegen_flags: <defaults>
</compile_context>

<pallas_src>
import functools

import jax
import jax.numpy as jnp
from jax.experimental import pallas as pl
from jax.experimental.pallas import tpu as pltpu

BN_EPS = 1e-5
LANE = 128                          # pad feature dims to multiples of this
SUBLANE = 8                         # f32 sublane granularity for the row/batch axis
STORE_H_MIN_IN_DIM = 512            # wide-input threshold: store h instead of recomputing
_VMEM_BUDGET = 48 * 1024 * 1024     # stay well under v7x's 64 MiB physical VMEM per TC
_VMEM_HEADROOM = 6 * 1024 * 1024    # compiler scratch / misc


def _round_up(v, m):
    return (v + m - 1) // m * m


def _cdiv(a, b):
    return -(-a // b)


def _fit_rows(tile_rows, fixed_bytes, per_row_bytes, row_align):
    """Shrink the row tile until fixed + rows*per_row fits the VMEM budget."""
    budget = _VMEM_BUDGET - _VMEM_HEADROOM
    # TODO(synk): if fixed_bytes (resident weights) alone exceeds the budget (e.g. hidden~4k
    # bf16 weights on v7x), switch to contraction-axis tiling of W1t/W2t instead of residency.
    tile_rows = max(row_align, tile_rows // row_align * row_align)
    while tile_rows > row_align and fixed_bytes + tile_rows * per_row_bytes > budget:
        tile_rows = max(row_align, _round_up(tile_rows // 2, row_align))
    return tile_rows


def _derive_tiles(n, tile_cap, row_align):
    """Adaptive row tiling: limit zero-row padding, prefer an even tile count (megacore)."""
    tile_cap = max(row_align, tile_cap // row_align * row_align)
    tiles = _cdiv(n, tile_cap)
    if n >= 2 * row_align:
        tiles = max(tiles, 2)        # keep both v7x TensorCores busy
        tiles += tiles % 2
    tile_n = _round_up(_cdiv(n, tiles), row_align)
    tiles = _cdiv(n, tile_n)
    if n >= 2 * row_align:
        tiles += tiles % 2           # extra all-zero tile is harmless, keeps the split even
    return tile_n, tiles, tiles * tile_n


def _vmem_limit(fixed_bytes, tile_rows, per_row_bytes):
    need = fixed_bytes + tile_rows * per_row_bytes
    need = need + need // 2 + (8 << 20)          # +50% + 8 MiB headroom
    return int(min(_VMEM_BUDGET, max(32 << 20, need)))


def _resident_spec(block_shape, index_map):
    """BlockSpec for a grid-invariant operand: single-buffered (constant index map, so one
    VMEM copy suffices -- halves resident-weight VMEM vs default double-buffering)."""
    try:
        return pl.BlockSpec(block_shape, index_map, pipeline_mode=pl.Buffered(1))
    except (AttributeError, TypeError):          # older JAX: default buffering
        return pl.BlockSpec(block_shape, index_map)


# --------------------- Pass 1a (narrow inputs): Gram-matrix statistics ---------------------
def _gram_stats_kernel(x_ref, g_ref, s_ref, *, compute_dtype):
    @pl.when(pl.program_id(1) == 0)
    def _():
        g_ref[...] = jnp.zeros_like(g_ref)
        s_ref[...] = jnp.zeros_like(s_ref)

    x = x_ref[...]
    xc = x.astype(compute_dtype)
    gram = jax.lax.dot_general(xc, xc, (((0,), (0,)), ((), ())),
                               preferred_element_type=jnp.float32)        # (in_p, in_p)
    g_ref[...] += gram[None]
    xr = x.astype(jnp.float32).reshape(x.shape[0] // SUBLANE, SUBLANE, x.shape[1])
    s_ref[...] += jnp.sum(xr, axis=0)[None]                               # (1, 8, in_p)


# ------------------ Pass 1b (wide inputs): h = x @ W1t + column statistics -----------------
def _h_stats_kernel(x_ref, w1t_ref, h_ref, sum_ref, sumsq_ref):
    @pl.when(pl.program_id(1) == 0)
    def _():
        sum_ref[...] = jnp.zeros_like(sum_ref)
        sumsq_ref[...] = jnp.zeros_like(sumsq_ref)

    h = jnp.dot(x_ref[...].astype(w1t_ref.dtype), w1t_ref[...],
                preferred_element_type=jnp.float32)
    h_ref[...] = h.astype(h_ref.dtype)
    hr = h.reshape(h.shape[0] // SUBLANE, SUBLANE, h.shape[1])
    sum_ref[...] += jnp.sum(hr, axis=0)[None]
    sumsq_ref[...] += jnp.sum(hr * hr, axis=0)[None]


# --------------- Pass 2a (narrow inputs): matmul1 + folded-BN + ReLU + matmul2 --------------
def _fused_from_x_kernel(x_ref, w1t_ref, scale_ref, shift_ref, w2t_ref, o_ref):
    h = jnp.dot(x_ref[...].astype(w1t_ref.dtype), w1t_ref[...],
                preferred_element_type=jnp.float32)
    h = jnp.maximum(h * scale_ref[...] + shift_ref[...], 0.0)
    o_ref[...] = jnp.dot(h.astype(w2t_ref.dtype), w2t_ref[...],
                         preferred_element_type=jnp.float32).astype(o_ref.dtype)


# ------------------- Pass 2b (wide inputs): folded-BN + ReLU + matmul2 from h --------------
def _fused_from_h_kernel(h_ref, scale_ref, shift_ref, w2t_ref, o_ref):
    h = h_ref[...].astype(jnp.float32)
    h = jnp.maximum(h * scale_ref[...] + shift_ref[...], 0.0)
    o_ref[...] = jnp.dot(h.astype(w2t_ref.dtype), w2t_ref[...],
                         preferred_element_type=jnp.float32).astype(o_ref.dtype)


def prepare_params(w1, gamma, beta, w2, compute_dtype=jnp.bfloat16):
    """One-time parameter prep (outside the hot path): pad feature dims to LANE multiples,
    pre-transpose PyTorch-layout weights, cast matmul operands to the compute dtype."""
    hidden, in_dim = w1.shape
    out_dim = w2.shape[0]
    in_p = _round_up(in_dim, LANE)
    hid_p = _round_up(hidden, LANE)
    out_p = _round_up(out_dim, LANE)

    w1t = jnp.zeros((in_p, hid_p), compute_dtype).at[:in_dim, :hidden].set(
        w1.T.astype(compute_dtype))
    w2t = jnp.zeros((hid_p, out_p), compute_dtype).at[:hidden, :out_dim].set(
        w2.T.astype(compute_dtype))
    gamma_p = jnp.zeros((1, hid_p), jnp.float32).at[0, :hidden].set(gamma.astype(jnp.float32))
    beta_p = jnp.zeros((1, hid_p), jnp.float32).at[0, :hidden].set(beta.astype(jnp.float32))
    return dict(w1t=w1t, w2t=w2t, gamma=gamma_p, beta=beta_p, dims=(in_dim, hidden, out_dim))


def mlp_forward(x, params, tile_rows=512, store_h=None, out_dtype=jnp.float32):
    """x: [N, input_dim].  Returns [N, output_dim] in `out_dtype` (f32 by default)."""
    w1t, w2t = params["w1t"], params["w2t"]
    gamma_p, beta_p = params["gamma"], params["beta"]
    in_dim, _hidden, out_dim = params["dims"]

    cdt = w1t.dtype
    cbytes = jnp.dtype(cdt).itemsize
    xbytes = jnp.dtype(x.dtype).itemsize
    obytes = jnp.dtype(out_dtype).itemsize

    n = x.shape[0]
    in_p, hid_p = w1t.shape
    out_p = w2t.shape[1]

    if store_h is None:
        store_h = in_dim >= STORE_H_MIN_IN_DIM
    # Row alignment: the stored-h array uses the compute dtype, so align to its sublane pack.
    row_align = SUBLANE * max(1, 4 // cbytes) if store_h else SUBLANE

    # ---- VMEM budgeting: resident ("fixed") bytes + per-row-tile bytes for each pass. ----
    if store_h:
        fixed_stats = in_p * hid_p * cbytes + 4 * SUBLANE * hid_p * 4
        per_row_stats = 2 * in_p * xbytes + 2 * hid_p * cbytes + hid_p * 4 + in_p * cbytes
        fixed_fused = hid_p * out_p * cbytes + 2 * hid_p * 4
        per_row_fused = 2 * hid_p * cbytes + 2 * out_p * obytes + hid_p * 4
    else:
        fixed_stats = 2 * in_p * in_p * 4 + 2 * SUBLANE * in_p * 4
        per_row_stats = 2 * in_p * xbytes + 2 * in_p * cbytes
        fixed_fused = (in_p * hid_p + hid_p * out_p) * cbytes + 2 * hid_p * 4
        per_row_fused = 2 * in_p * xbytes + in_p * cbytes + 2 * out_p * obytes + hid_p * 4

    tile_rows = _fit_rows(tile_rows, fixed_stats, per_row_stats, row_align)
    tile_rows = _fit_rows(tile_rows, fixed_fused, per_row_fused, row_align)
    tile_n, tiles, n_pad = _derive_tiles(n, tile_rows, row_align)

    p_par = 2 if (tiles >= 2 and tiles % 2 == 0) else 1   # leading "parallel" axis for stats
    t_seq = tiles // p_par

    # Pad x only if needed; keep its dtype (the MXU cast happens inside the kernels).
    if n_pad != n or in_p != in_dim:
        x_p = jnp.pad(x, ((0, n_pad - n), (0, in_p - in_dim)))
    else:
        x_p = x

    stats_params = pltpu.CompilerParams(
        dimension_semantics=("parallel", "arbitrary"),
        vmem_limit_bytes=_vmem_limit(fixed_stats, tile_n, per_row_stats))
    fused_params = pltpu.CompilerParams(
        dimension_semantics=("parallel",),
        vmem_limit_bytes=_vmem_limit(fixed_fused, tile_n, per_row_fused))

    # ------------------------------ Pass 1: column statistics ------------------------------
    if store_h:
        stats_cost = pl.CostEstimate(
            flops=2 * n_pad * in_p * hid_p + 3 * n_pad * hid_p,
            transcendentals=0,
            bytes_accessed=(n_pad * in_p * xbytes + in_p * hid_p * cbytes
                            + n_pad * hid_p * cbytes + 2 * p_par * SUBLANE * hid_p * 4))
        h_pad, sum_part, sumsq_part = pl.pallas_call(
            _h_stats_kernel,
            out_shape=(jax.ShapeDtypeStruct((n_pad, hid_p), cdt),
                       jax.ShapeDtypeStruct((p_par, SUBLANE, hid_p), jnp.float32),
                       jax.ShapeDtypeStruct((p_par, SUBLANE, hid_p), jnp.float32)),
            grid=(p_par, t_seq),
            in_specs=[
                pl.BlockSpec((tile_n, in_p), lambda p, t: (p * t_seq + t, 0)),
                _resident_spec((in_p, hid_p), lambda p, t: (0, 0)),
            ],
            out_specs=(
                pl.BlockSpec((tile_n, hid_p), lambda p, t: (p * t_seq + t, 0)),
                pl.BlockSpec((1, SUBLANE, hid_p), lambda p, t: (p, 0, 0)),
                pl.BlockSpec((1, SUBLANE, hid_p), lambda p, t: (p, 0, 0)),
            ),
            compiler_params=stats_params,
            cost_estimate=stats_cost,
        )(x_p, w1t)
        col_sum = sum_part.sum(axis=(0, 1))[None, :]
        col_sumsq = sumsq_part.sum(axis=(0, 1))[None, :]
    else:
        stats_cost = pl.CostEstimate(
            flops=2 * n_pad * in_p * in_p + n_pad * in_p,
            transcendentals=0,
            bytes_accessed=(n_pad * in_p * xbytes
                            + p_par * (in_p * in_p + SUBLANE * in_p) * 4))
        g_part, s_part = pl.pallas_call(
            functools.partial(_gram_stats_kernel, compute_dtype=cdt),
            out_shape=(jax.ShapeDtypeStruct((p_par, in_p, in_p), jnp.float32),
                       jax.ShapeDtypeStruct((p_par, SUBLANE, in_p), jnp.float32)),
            grid=(p_par, t_seq),
            in_specs=[pl.BlockSpec((tile_n, in_p), lambda p, t: (p * t_seq + t, 0))],
            out_specs=(
                pl.BlockSpec((1, in_p, in_p), lambda p, t: (p, 0, 0)),
                pl.BlockSpec((1, SUBLANE, in_p), lambda p, t: (p, 0, 0)),
            ),
            compiler_params=stats_params,
            cost_estimate=stats_cost,
        )(x_p)
        # Tiny folds (O(in_p*hid_p)) in the wrapper: col stats of h = x @ W1t from G and s.
        w1t_f32 = w1t.astype(jnp.float32)
        s = s_part.sum(axis=(0, 1))                       # (in_p,)
        g = g_part.sum(axis=0)                            # (in_p, in_p)
        col_sum = (s @ w1t_f32)[None, :]
        col_sumsq = jnp.sum((g @ w1t_f32) * w1t_f32, axis=0)[None, :]

    # ---- Fold BN into a single per-column scale/shift (tiny [hid_p] vector math). ----
    inv_n = 1.0 / n                                       # real batch size (padded rows are 0)
    mean = col_sum * inv_n
    var = jnp.maximum(col_sumsq * inv_n - mean * mean, 0.0)   # biased variance
    inv_std = jax.lax.rsqrt(var + BN_EPS)
    scale = gamma_p * inv_std
    shift = beta_p - mean * scale

    # ------------------------------ Pass 2: fused per-row-tile ------------------------------
    resident_tail = [
        _resident_spec((1, hid_p), lambda i: (0, 0)),         # folded BN scale
        _resident_spec((1, hid_p), lambda i: (0, 0)),         # folded BN shift
        _resident_spec((hid_p, out_p), lambda i: (0, 0)),     # W2t
    ]
    out_spec = pl.BlockSpec((tile_n, out_p), lambda i: (i, 0))
    out_shape = jax.ShapeDtypeStruct((n_pad, out_p), out_dtype)

    if store_h:
        fused_cost = pl.CostEstimate(
            flops=2 * n_pad * hid_p * out_p + 3 * n_pad * hid_p,
            transcendentals=0,
            bytes_accessed=(n_pad * hid_p * cbytes + hid_p * out_p * cbytes
                            + 2 * hid_p * 4 + n_pad * out_p * obytes))
        out_padded = pl.pallas_call(
            _fused_from_h_kernel,
            out_shape=out_shape,
            grid=(tiles,),
            in_specs=[pl.BlockSpec((tile_n, hid_p), lambda i: (i, 0))] + resident_tail,
            out_specs=out_spec,
            compiler_params=fused_params,
            cost_estimate=fused_cost,
        )(h_pad, scale, shift, w2t)
    else:
        fused_cost = pl.CostEstimate(
            flops=2 * n_pad * hid_p * (in_p + out_p) + 3 * n_pad * hid_p,
            transcendentals=0,
            bytes_accessed=(n_pad * in_p * xbytes + (in_p * hid_p + hid_p * out_p) * cbytes
                            + 2 * hid_p * 4 + n_pad * out_p * obytes))
        out_padded = pl.pallas_call(
            _fused_from_x_kernel,
            out_shape=out_shape,
            grid=(tiles,),
            in_specs=[pl.BlockSpec((tile_n, in_p), lambda i: (i, 0)),
                      _resident_spec((in_p, hid_p), lambda i: (0, 0))] + resident_tail,
            out_specs=out_spec,
            compiler_params=fused_params,
            cost_estimate=fused_cost,
        )(x_p, w1t, scale, shift, w2t)

    return out_padded[:n, :out_dim]


def mlp_reference(x, w1, gamma, beta, w2):
    h = x @ w1.T
    mean = h.mean(axis=0, keepdims=True)
    var = h.var(axis=0, keepdims=True)        # biased, matches training-mode BN
    h = (h - mean) / jnp.sqrt(var + BN_EPS) * gamma + beta
    h = jnp.maximum(h, 0.0)
    return h @ w2.T


if __name__ == "__main__":
    # Small shapes consistent with the module.
    N, input_dim, hidden_dim, output_dim = 8, 16, 32, 8

    key = jax.random.PRNGKey(0)
    kx, kw1, kw2 = jax.random.split(key, 3)

    x = jax.random.normal(kx, (N, input_dim), dtype=jnp.float32)
    b1 = 1.0 / jnp.sqrt(input_dim)
    b2 = 1.0 / jnp.sqrt(hidden_dim)
    w1 = jax.random.uniform(kw1, (hidden_dim, input_dim), minval=-b1, maxval=b1,
                            dtype=jnp.float32)
    w2 = jax.random.uniform(kw2, (output_dim, hidden_dim), minval=-b2, maxval=b2,
                            dtype=jnp.float32)
    gamma = jnp.ones((hidden_dim,), dtype=jnp.float32)   # BN weight
    beta = jnp.zeros((hidden_dim,), dtype=jnp.float32)   # BN bias

    ref = mlp_reference(x, w1, gamma, beta, w2)

    # f32 compute path: tight check of both stats modes against the module semantics.
    params_f32 = prepare_params(w1, gamma, beta, w2, compute_dtype=jnp.float32)
    out_gram = jax.block_until_ready(mlp_forward(x, params_f32))                # gram stats
    out_storeh = jax.block_until_ready(mlp_forward(x, params_f32, store_h=True))  # store-h
    assert out_gram.shape == (N, output_dim) and out_storeh.shape == (N, output_dim)
    assert jnp.allclose(out_gram, ref, atol=1e-4, rtol=1e-4), "f32 gram path mismatch"
    assert jnp.allclose(out_storeh, ref, atol=1e-4, rtol=1e-4), "f32 store-h path mismatch"

    # bf16 MXU operands with f32 accumulation (production/perf default): looser check.
    params_bf16 = prepare_params(w1, gamma, beta, w2, compute_dtype=jnp.bfloat16)
    out_bf = jax.block_until_ready(mlp_forward(x, params_bf16))
    out_bf_sh = jax.block_until_ready(mlp_forward(x, params_bf16, store_h=True))
    assert jnp.allclose(out_bf, ref, atol=5e-2, rtol=5e-2), "bf16 gram path mismatch"
    assert jnp.allclose(out_bf_sh, ref, atol=5e-2, rtol=5e-2), "bf16 store-h path mismatch"

    print("KERNEL_OK")
</pallas_src>

<mosaic_0001>
module attributes {stable_mosaic.version = 11 : i64} {
  func.func @_gram_stats_kernel(%arg0: i32, %arg1: i32, %arg2: memref<8x128xf32, #tpu.memory_space<vmem>>, %arg3: memref<1x128x128xf32, #tpu.memory_space<vmem>>, %arg4: memref<1x8x128xf32, #tpu.memory_space<vmem>>) attributes {dimension_semantics = [#tpu.dimension_semantics<parallel>, #tpu.dimension_semantics<arbitrary>], iteration_bounds = array<i64: 1, 1>, scalar_prefetch = 0 : i64, scratch_operands = 0 : i64, tpu.core_type = #tpu.core_type<tc>, window_params = [{transform_indices = @transform_0, window_bounds = array<i64: 8, 128>}, {transform_indices = @transform_1, window_bounds = array<i64: 1, 128, 128>}, {transform_indices = @transform_2, window_bounds = array<i64: 1, 8, 128>}]} {
    %c0_i32 = arith.constant 0 : i32
    %0 = arith.cmpi eq, %arg1, %c0_i32 : i32
    %1 = arith.extui %0 : i1 to i32
    %c0_i32_0 = arith.constant 0 : i32
    %2 = arith.cmpi ne, %1, %c0_i32_0 : i32
    scf.if %2 {
      %cst_15 = arith.constant 0.000000e+00 : f32
      %15 = vector.broadcast %cst_15 : f32 to vector<1x128x128xf32>
      %c0_16 = arith.constant 0 : index
      %c0_17 = arith.constant 0 : index
      %c0_18 = arith.constant 0 : index
      %16 = vector.load %arg3[%c0_16, %c0_17, %c0_18] : memref<1x128x128xf32, #tpu.memory_space<vmem>>, vector<1x128x128xf32>
      tpu.vector_store %arg3[%c0_16, %c0_17, %c0_18], %15 {strides = array<i32>} : memref<1x128x128xf32, #tpu.memory_space<vmem>>, vector<1x128x128xf32>,
      %cst_19 = arith.constant 0.000000e+00 : f32
      %17 = vector.broadcast %cst_19 : f32 to vector<1x8x128xf32>
      %c0_20 = arith.constant 0 : index
      %c0_21 = arith.constant 0 : index
      %c0_22 = arith.constant 0 : index
      %18 = vector.load %arg4[%c0_20, %c0_21, %c0_22] : memref<1x8x128xf32, #tpu.memory_space<vmem>>, vector<1x8x128xf32>
      tpu.vector_store %arg4[%c0_20, %c0_21, %c0_22], %17 {strides = array<i32>} : memref<1x8x128xf32, #tpu.memory_space<vmem>>, vector<1x8x128xf32>,
    } else {
    }
    %c0 = arith.constant 0 : index
    %c0_1 = arith.constant 0 : index
    %3 = vector.load %arg2[%c0, %c0_1] : memref<8x128xf32, #tpu.memory_space<vmem>>, vector<8x128xf32>
    %cst = arith.constant dense<0.000000e+00> : vector<128x128xf32>
    %4 = tpu.matmul %3, %3, %cst {dimension_numbers = #tpu.dot_dimension_numbers<[0], [0], [1], [1], [0, 1, 1, 1], [], []>} : vector<8x128xf32>, vector<8x128xf32>, vector<128x128xf32> -> vector<128x128xf32>
    %c0_2 = arith.constant 0 : index
    %c0_3 = arith.constant 0 : index
    %c0_4 = arith.constant 0 : index
    %5 = vector.load %arg3[%c0_2, %c0_3, %c0_4] : memref<1x128x128xf32, #tpu.memory_space<vmem>>, vector<1x128x128xf32>
    %6 = vector.shape_cast %4 : vector<128x128xf32> to vector<1x128x128xf32>
    %7 = arith.addf %5, %6 : vector<1x128x128xf32>
    %c0_5 = arith.constant 0 : index
    %c0_6 = arith.constant 0 : index
    %c0_7 = arith.constant 0 : index
    %8 = vector.load %arg3[%c0_5, %c0_6, %c0_7] : memref<1x128x128xf32, #tpu.memory_space<vmem>>, vector<1x128x128xf32>
    tpu.vector_store %arg3[%c0_5, %c0_6, %c0_7], %7 {strides = array<i32>} : memref<1x128x128xf32, #tpu.memory_space<vmem>>, vector<1x128x128xf32>,
    %9 = vector.shape_cast %3 : vector<8x128xf32> to vector<1x8x128xf32>
    %c0_8 = arith.constant 0 : index
    %c0_9 = arith.constant 0 : index
    %c0_10 = arith.constant 0 : index
    %10 = vector.load %arg4[%c0_8, %c0_9, %c0_10] : memref<1x8x128xf32, #tpu.memory_space<vmem>>, vector<1x8x128xf32>
    %cst_11 = arith.constant dense<0.000000e+00> : vector<8x128xf32>
    %11 = vector.multi_reduction <add>, %9, %cst_11 [0] : vector<1x8x128xf32> to vector<8x128xf32>
    %12 = vector.shape_cast %11 : vector<8x128xf32> to vector<1x8x128xf32>
    %13 = arith.addf %10, %12 : vector<1x8x128xf32>
    %c0_12 = arith.constant 0 : index
    %c0_13 = arith.constant 0 : index
    %c0_14 = arith.constant 0 : index
    %14 = vector.load %arg4[%c0_12, %c0_13, %c0_14] : memref<1x8x128xf32, #tpu.memory_space<vmem>>, vector<1x8x128xf32>
    tpu.vector_store %arg4[%c0_12, %c0_13, %c0_14], %13 {strides = array<i32>} : memref<1x8x128xf32, #tpu.memory_space<vmem>>, vector<1x8x128xf32>,
    return
  }
  func.func @transform_0(%arg0: i32, %arg1: i32) -> (i32, i32) {
    %c1_i32 = arith.constant 1 : i32
    %0 = arith.muli %arg0, %c1_i32 : i32
    %1 = arith.addi %0, %arg1 : i32
    %c0_i32 = arith.constant 0 : i32
    %c0_i32_0 = arith.constant 0 : i32
    return %1, %c0_i32 : i32, i32
  }
  func.func @transform_1(%arg0: i32, %arg1: i32) -> (i32, i32, i32) {
    %c0_i32 = arith.constant 0 : i32
    %c0_i32_0 = arith.constant 0 : i32
    %c0_i32_1 = arith.constant 0 : i32
    return %arg0, %c0_i32, %c0_i32_0 : i32, i32, i32
  }
  func.func @transform_2(%arg0: i32, %arg1: i32) -> (i32, i32, i32) {
    %c0_i32 = arith.constant 0 : i32
    %c0_i32_0 = arith.constant 0 : i32
    %c0_i32_1 = arith.constant 0 : i32
    return %arg0, %c0_i32, %c0_i32_0 : i32, i32, i32
  }
}

</mosaic_0001>

<bundles_post_ra>
// kernel: tpu_custom_call.1
= control target key start
LH: loop header
LB: loop body
LE: loop exit
PB: predicated region body
PF: predicated region fallthrough
CT: control target
= control target key end

     0   :  { %8 = vsyncpa [#allocation3], 0  ;;  %s570_s0 = inlined_call_operand.hbm [shape: f32[8,128], index: 0, kind: input, shape index: {}]   ;;  %s571_s1 = inlined_call_operand.hbm [shape: f32[1,128,128], index: 1, kind: output, shape index: {0}]   ;;  %s572_s2 = inlined_call_operand.hbm [shape: f32[1,8,128], index: 2, kind: output, shape index: {1}]  }
   0x1   :  { %9 = vsyncpa [#allocation4], 0 }
   0x2   :  { %10 = vsyncpa [#allocation7], 0  ;;  %s498_s9 = smov [#allocation2]   ;;  %s426_s13 = scalar_lea.hbm %s570_s0, 128 }
   0x3   :  { %s20_s10 = sshll.u32 %s498_s9, 4  ;;  %p427_p0 = scmp.ne.s32.totalorder %s570_s0, %s426_s13  ;;  %s21_s10 = int_to_ptr.vmem [resolvable:$true] %s20_s10 }
   0x4   :  { %p430_p1 = scmp.lt.u32.totalorder %s426_s13, %s570_s0 }
   0x6   :  { %p432_p2 = pnand %p430_p1, %p427_p0 }
   0x8   :  { %435 = shalt.err (!%p432_p2)
}
   0x9   :  { %s436_s18 = scalar_lea.vmem %s21_s10, 128  ;;  %p441_p4 = scmp.lt.s32.totalorder %s21_s10, %s21_s10 }
   0xa   :  { %p437_p3 = scmp.ne.s32.totalorder %s21_s10, %s436_s18  ;;  %p442_p5 = scmp.lt.s32.totalorder %s436_s18, %s436_s18 }
   0xc   :  { %p443_p6 = por %p442_p5, %p441_p4 }
   0xe   :  { %p444_p7 = pnand %p443_p6, %p437_p3 }
  0x10   :  { %447 = shalt.err (!%p444_p7)
}
  0x11   :  { %23 = dma.hbm_to_vmem [thread:$0]  %s570_s0, 128, %s21_s10, [#allocation3]  }
  0x12   :  { %492 = dma.done.wait [#allocation3], 128  }
  0x13   :  { %493 = vsyncadd [#allocation3], 4294967168  ;;  %v49_v0 = vld [vmem:[#allocation2] sm:$0xff]  ;;  %vm82_vm0 = vcmask 64512   ;;  %s499_s0 = smov [#allocation6]  }
  0x14   :  { %50 = vxpose.xlu0.b32.start.end [1/1] (short) %v49_v0, 128  ;;  %392 = vmatprep.subr.mxu0 %v49_v0  ;;  %s346_s21 = sshll.u32 %s499_s0, 4  ;;  %327 = vst [vmem:[#allocation6] sm:$0xff] %v49_v0  ;;  %s347_s21 = int_to_ptr.vmem [resolvable:$true] %s346_s21 }
  0x15   :  { %393 = vmatpush3.msra.mxu0 %v49_v0  ;;  %418 = vmatprep.subr.mxu1 %v49_v0  ;;  %s448_s22 = scalar_lea.vmem %s347_s21, 128  ;;  %p453_p9 = scmp.lt.s32.totalorder %s347_s21, %s347_s21 }
  0x16   :  { %419 = vmatpush3.msra.mxu1 %v49_v0  ;;  %p449_p8 = scmp.ne.s32.totalorder %s347_s21, %s448_s22  ;;  %p454_p10 = scmp.lt.s32.totalorder %s448_s22, %s448_s22 }
  0x18   :  { %p455_p11 = por %p454_p10, %p453_p9 }
  0x1a   :  { %p456_p12 = pnand %p455_p11, %p449_p8 }
  0x94   :  { %v66_v1 = vpop.trf.xlu0 }
  0x95   :  { %394 = vmatprep.mubr.msk.f32.mxu0 %vm82_vm0, %v66_v1 }
  0x98   :  { %v67_v2 = vpop.trf.xlu0 }
  0x99   :  { %395 = vmatmul.mubr.msk.f32.vlgmr.msra.gmra.mrb[0].mxu0 %vm82_vm0, %v67_v2 }
  0x9c   :  { %v68_v3 = vpop.trf.xlu0 }
  0x9d   :  { %397 = vmatprep.mubr.msk.f32.mxu0 %vm82_vm0, %v68_v3 }
  0xa0   :  { %v69_v4 = vpop.trf.xlu0 }
  0xa1   :  { %398 = vmatmul.mubr.msk.f32.gmra.mrb[2].mxu0 %vm82_vm0, %v69_v4 }
  0xa4   :  { %v70_v5 = vpop.trf.xlu0 }
  0xa5   :  { %400 = vmatprep.mubr.msk.f32.mxu0 %vm82_vm0, %v70_v5 }
  0xa8   :  { %v71_v6 = vpop.trf.xlu0 }
  0xa9   :  { %401 = vmatmul.mubr.msk.f32.gmra.mrb[4].mxu0 %vm82_vm0, %v71_v6 }
  0xac   :  { %v72_v7 = vpop.trf.xlu0 }
  0xad   :  { %403 = vmatprep.mubr.msk.f32.mxu0 %vm82_vm0, %v72_v7 }
  0xb0   :  { %v73_v8 = vpop.trf.xlu0 }
  0xb1   :  { %404 = vmatmul.mubr.msk.f32.gmra.mrb[6].mxu0 %vm82_vm0, %v73_v8 }
  0xb4   :  { %v74_v9 = vpop.trf.xlu0 }
  0xb5   :  { %406 = vmatprep.mubr.msk.f32.mxu1 %vm82_vm0, %v74_v9 }
  0xb8   :  { %v75_v10 = vpop.trf.xlu0 }
  0xb9   :  { %407 = vmatmul.mubr.msk.f32.vlgmr.msra.gmra.mrb[0].mxu1 %vm82_vm0, %v75_v10 }
  0xbc   :  { %v76_v11 = vpop.trf.xlu0 }
  0xbd   :  { %409 = vmatprep.mubr.msk.f32.mxu1 %vm82_vm0, %v76_v11 }
  0xc0   :  { %v77_v12 = vpop.trf.xlu0 }
  0xc1   :  { %410 = vmatmul.mubr.msk.f32.gmra.mrb[2].mxu1 %vm82_vm0, %v77_v12 }
  0xc4   :  { %v78_v13 = vpop.trf.xlu0 }
  0xc5   :  { %412 = vmatprep.mubr.msk.f32.mxu1 %vm82_vm0, %v78_v13 }
  0xc8   :  { %v79_v14 = vpop.trf.xlu0 }
  0xc9   :  { %413 = vmatmul.mubr.msk.f32.gmra.mrb[4].mxu1 %vm82_vm0, %v79_v14 }
  0xcc   :  { %v80_v15 = vpop.trf.xlu0 }
  0xcd   :  { %415 = vmatprep.mubr.msk.f32.mxu1 %vm82_vm0, %v80_v15 }
  0xd0   :  { %v81_v16 = vpop.trf.xlu0 }
  0xd1   :  { %416 = vmatmul.mubr.msk.f32.gmra.mrb[6].mxu1 %vm82_vm0, %v81_v16 }
  0xd2   :  { %459 = shalt.err (!%p456_p12)
}
  0xd3   :  { %s460_s25 = scalar_lea.hbm %s572_s2, 128 }
  0xd4   :  { %p461_p13 = scmp.ne.s32.totalorder %s572_s2, %s460_s25  ;;  %p464_p0 = scmp.lt.u32.totalorder %s460_s25, %s572_s2 }
  0xd6   :  { %p466_p1 = pnand %p464_p0, %p461_p13 }
  0xd8   :  { %469 = shalt.err (!%p466_p1)
}
  0xd9   :  { %349 = dma.vmem_to_hbm [thread:$0]  %s347_s21, 128, %s572_s2, [#allocation7]  }
  0xda   :  { %s500_s2 = smov [#allocation5]  }
  0xdb   :  { %s333_s4 = sshll.u32 %s500_s2, 4  ;;  %s334_s4 = int_to_ptr.vmem [resolvable:$true] %s333_s4 }
  0xdc   :  { %s470_s5 = scalar_lea.vmem %s334_s4, 2048  ;;  %p475_p3 = scmp.lt.s32.totalorder %s334_s4, %s334_s4 }
  0xdd   :  { %p471_p2 = scmp.ne.s32.totalorder %s334_s4, %s470_s5  ;;  %p476_p4 = scmp.lt.s32.totalorder %s470_s5, %s470_s5 }
  0xdf   :  { %p477_p5 = por %p476_p4, %p475_p3 }
  0xe1   :  { %p478_p6 = pnand %p477_p5, %p471_p2 }
 0x16c   :  { %v396_v17 = vpop.f32.mrb[0].mxu0 }
 0x16d   :  { %v197_v18 = vpop.f32.mrb[1].mxu0  ;;  %309 = vst [vmem:[#allocation5 + $0x8] sm:$0xff] %v396_v17 }
 0x16e   :  { %308 = vst [vmem:[#allocation5] sm:$0xff] %v197_v18 }
 0x174   :  { %v399_v19 = vpop.f32.mrb[2].mxu0 }
 0x175   :  { %v207_v20 = vpop.f32.mrb[3].mxu0  ;;  %311 = vst [vmem:[#allocation5 + $0x18] sm:$0xff] %v399_v19 }
 0x176   :  { %310 = vst [vmem:[#allocation5 + $0x10] sm:$0xff] %v207_v20 }
 0x17c   :  { %v402_v21 = vpop.f32.mrb[4].mxu0 }
 0x17d   :  { %v217_v22 = vpop.f32.mrb[5].mxu0  ;;  %313 = vst [vmem:[#allocation5 + $0x28] sm:$0xff] %v402_v21 }
 0x17e   :  { %312 = vst [vmem:[#allocation5 + $0x20] sm:$0xff] %v217_v22 }
 0x184   :  { %v405_v23 = vpop.f32.mrb[6].mxu0 }
 0x185   :  { %v227_v24 = vpop.f32.mrb[7].mxu0  ;;  %315 = vst [vmem:[#allocation5 + $0x38] sm:$0xff] %v405_v23 }
 0x186   :  { %314 = vst [vmem:[#allocation5 + $0x30] sm:$0xff] %v227_v24 }
 0x18c   :  { %v408_v25 = vpop.f32.mrb[0].mxu1 }
 0x18d   :  { %v237_v26 = vpop.f32.mrb[1].mxu1  ;;  %317 = vst [vmem:[#allocation5 + $0x48] sm:$0xff] %v408_v25 }
 0x18e   :  { %316 = vst [vmem:[#allocation5 + $0x40] sm:$0xff] %v237_v26 }
 0x194   :  { %v411_v27 = vpop.f32.mrb[2].mxu1 }
 0x195   :  { %v247_v28 = vpop.f32.mrb[3].mxu1  ;;  %319 = vst [vmem:[#allocation5 + $0x58] sm:$0xff] %v411_v27 }
 0x196   :  { %318 = vst [vmem:[#allocation5 + $0x50] sm:$0xff] %v247_v28 }
 0x19c   :  { %v414_v29 = vpop.f32.mrb[4].mxu1 }
 0x19d   :  { %v257_v30 = vpop.f32.mrb[5].mxu1  ;;  %321 = vst [vmem:[#allocation5 + $0x68] sm:$0xff] %v414_v29 }
 0x19e   :  { %320 = vst [vmem:[#allocation5 + $0x60] sm:$0xff] %v257_v30 }
 0x1a4   :  { %v417_v31 = vpop.f32.mrb[6].mxu1 }
 0x1a5   :  { %v267_v32 = vpop.f32.mrb[7].mxu1  ;;  %323 = vst [vmem:[#allocation5 + $0x78] sm:$0xff] %v417_v31 }
 0x1a6   :  { %322 = vst [vmem:[#allocation5 + $0x70] sm:$0xff] %v267_v32 }
 0x1a7   :  { %481 = shalt.err (!%p478_p6)
}
 0x1a8   :  { %s482_s8 = scalar_lea.hbm %s571_s1, 2048 }
 0x1a9   :  { %p483_p7 = scmp.ne.s32.totalorder %s571_s1, %s482_s8  ;;  %p486_p8 = scmp.lt.u32.totalorder %s482_s8, %s571_s1 }
 0x1ab   :  { %p488_p9 = pnand %p486_p8, %p483_p7 }
 0x1ad   :  { %491 = shalt.err (!%p488_p9)
}
 0x1ae   :  { %s501_s13 = smov 128   ;;  %s502_s14 = smov 8  }
 0x1af   :  { %339 = dma.vmem_to_hbm [thread:$0]  %s334_s4, 2048, %s571_s1, [#allocation4], %s501_s13, %s501_s13, %s502_s14  }
 0x1b0   :  { %494 = dma.done.wait [#allocation4], 2048  }
 0x1b1   :  { %495 = vsyncadd [#allocation4], 4294965248 }
 0x1b2   :  { %496 = dma.done.wait [#allocation7], 128  }
 0x1b3   :  { %497 = vsyncadd [#allocation7], 4294967168 }
 0x1b4   :  { %356 = vsyncpa [#allocation3], 1 }
 0x1b5   :  { %357 = vsyncpa [#allocation4], 1 }
 0x1b6   :  { %358 = vsyncpa [#allocation7], 1 }

</bundles_post_ra>
